<compile_context>
chip_gen: v7x
topology: tpu7x:2x2x1
jax: 0.10.0
libtpu: 0.0.40
codegen_flags: <defaults>
</compile_context>

<pallas_src>
import jax
import jax.numpy as jnp
from jax.experimental import pallas as pl
from jax.experimental.pallas import tpu as pltpu

FLOAT_MIN = -3.4e38  # rllib.utils.torch_utils.FLOAT_MIN


def _round_up(x, m):
    return (x + m - 1) // m * m


def action_mask_fc_kernel(obs_ref, mask_ref,
                          w1_ref, b1_ref, w2_ref, b2_ref,
                          wh_ref, bh_ref,
                          logits_ref, value_ref):
    A = mask_ref.shape[-1]
    # Hidden layers: bf16 operands on the MXU, f32 accumulation, f32 bias + tanh.
    x = obs_ref[...].astype(jnp.bfloat16)                                       # [TB, D]
    h1 = jnp.tanh(jnp.dot(x, w1_ref[...],
                          preferred_element_type=jnp.float32) + b1_ref[...])    # [TB, H_pad]
    h2 = jnp.tanh(jnp.dot(h1.astype(jnp.bfloat16), w2_ref[...],
                          preferred_element_type=jnp.float32) + b2_ref[...])    # [TB, H_pad]
    # Fused heads in one MXU pass: lanes [0, A) policy logits, lane A the value head.
    head = jnp.dot(h2.astype(jnp.bfloat16), wh_ref[...],
                   preferred_element_type=jnp.float32) + bh_ref[...]            # [TB, F_pad]
    # Additive action mask without the log transcendental: the RLlib mask is 0/1, so
    # clamp(log(mask)) + logits == where(mask > 0, logits, FLOAT_MIN).  Single select.
    # TODO(synk): if action_mask can be a fractional probability, keep a log() path instead.
    logits_ref[...] = jnp.where(mask_ref[...] > 0, head[:, :A], FLOAT_MIN)
    value_ref[...] = head[:, A:A + 1]


def pack_params(params):
    """One-time (init) packing of TorchFC weights into bf16, lane-padded layouts."""
    D, H = params["w1"].shape
    A = params["w3"].shape[1]
    H_pad = _round_up(H, 128)           # hidden lane dim padded (zero pad is exact: tanh(0)=0)
    F_pad = _round_up(A + 1, 128)       # fused head: [W3 | Wv | 0]

    w1 = jnp.zeros((D, H_pad), jnp.bfloat16).at[:, :H].set(params["w1"].astype(jnp.bfloat16))
    b1 = jnp.zeros((1, H_pad), jnp.float32).at[:, :H].set(jnp.asarray(params["b1"]).reshape(1, H))
    w2 = jnp.zeros((H_pad, H_pad), jnp.bfloat16).at[:H, :H].set(params["w2"].astype(jnp.bfloat16))
    b2 = jnp.zeros((1, H_pad), jnp.float32).at[:, :H].set(jnp.asarray(params["b2"]).reshape(1, H))
    wh = jnp.zeros((H_pad, F_pad), jnp.bfloat16)
    wh = wh.at[:H, :A].set(params["w3"].astype(jnp.bfloat16))
    wh = wh.at[:H, A:A + 1].set(params["wv"].astype(jnp.bfloat16))
    bh = jnp.zeros((1, F_pad), jnp.float32)
    bh = bh.at[:, :A].set(jnp.asarray(params["b3"]).reshape(1, A))
    bh = bh.at[:, A:A + 1].set(jnp.asarray(params["bv"]).reshape(1, 1))
    return dict(w1=w1, b1=b1, w2=w2, b2=b2, wh=wh, bh=bh)


def action_mask_model_forward(obs, action_mask, packed, *, batch_tile=1024):
    """Masked-logits + value forward pass in a single Pallas kernel.

    obs:          [B, D] float (any float dtype; cast to bf16 in-kernel)
    action_mask:  [B, A] 0/1 mask (any dtype; bf16/int8 recommended for bandwidth)
    packed:       output of pack_params()
    returns: (masked_logits [B, A] f32, value [B, 1] f32)
    """
    B, D = obs.shape
    A = action_mask.shape[1]
    H_pad = packed["w1"].shape[1]
    F_pad = packed["wh"].shape[1]

    # ---- batch tile selection ------------------------------------------------
    TB = min(batch_tile, _round_up(B, 16))            # 16-row granularity (bf16-native sublanes)
    # v7x / megacore: avoid a single grid step when the batch is big enough to split.
    if B > 32 and _round_up(B, TB) // TB < 2:
        TB = _round_up(-(-B // 2), 16)

    # Conservative VMEM budget (v7x: 64 MiB physical, 32 MiB default scoped).
    obs_b = jnp.dtype(obs.dtype).itemsize
    mask_b = jnp.dtype(action_mask.dtype).itemsize

    def vmem_est(tb):
        io = 2 * tb * (obs_b * D + mask_b * A + 4 * A + 4)          # double-buffered in/out tiles
        tmp = 4 * tb * H_pad * 4                                    # h1/h2/head f32 temporaries
        wts = 2 * 2 * (D * H_pad + H_pad * H_pad + H_pad * F_pad)   # bf16 weights (double-buffered)
        wts += 2 * 4 * (2 * H_pad + F_pad)                          # f32 biases
        return io + tmp + wts

    while TB > 16 and vmem_est(TB) > 24 * 2 ** 20:
        TB = _round_up(TB // 2, 16)

    B_pad = _round_up(B, TB)
    if B_pad != B:
        # Batch-only zero padding (feature dims stay unpadded). For typical power-of-two
        # rollout batches this branch is dead; padded rows are sliced away below.
        obs = jnp.pad(obs, ((0, B_pad - B), (0, 0)))
        action_mask = jnp.pad(action_mask, ((0, B_pad - B), (0, 0)))
    grid = (B_pad // TB,)

    def resident(shape):  # weights/biases stay resident in VMEM across the batch grid
        return pl.BlockSpec(shape, lambda i: (0, 0))

    vmem_limit = int(min(max(2 * vmem_est(TB), 32 * 2 ** 20), 56 * 2 ** 20))

    logits, value = pl.pallas_call(
        action_mask_fc_kernel,
        out_shape=(jax.ShapeDtypeStruct((B_pad, A), jnp.float32),
                   jax.ShapeDtypeStruct((B_pad, 1), jnp.float32)),
        grid=grid,
        in_specs=[
            pl.BlockSpec((TB, D), lambda i: (i, 0)),    # obs, unpadded lanes (contiguous DMA)
            pl.BlockSpec((TB, A), lambda i: (i, 0)),    # action mask, unpadded lanes
            resident((D, H_pad)),                       # w1
            resident((1, H_pad)),                       # b1
            resident((H_pad, H_pad)),                   # w2
            resident((1, H_pad)),                       # b2
            resident((H_pad, F_pad)),                   # fused head weight [W3 | Wv | 0]
            resident((1, F_pad)),                       # fused head bias   [b3 | bv | 0]
        ],
        out_specs=[pl.BlockSpec((TB, A), lambda i: (i, 0)),
                   pl.BlockSpec((TB, 1), lambda i: (i, 0))],
        compiler_params=pltpu.CompilerParams(
            dimension_semantics=("parallel",),
            vmem_limit_bytes=vmem_limit),
    )(obs, action_mask,
      packed["w1"], packed["b1"], packed["w2"], packed["b2"],
      packed["wh"], packed["bh"])

    if B_pad != B:
        logits = logits[:B]
        value = value[:B]
    return logits, value


def reference_forward(obs, action_mask, params):
    h1 = jnp.tanh(obs @ params["w1"] + params["b1"])
    h2 = jnp.tanh(h1 @ params["w2"] + params["b2"])
    logits = h2 @ params["w3"] + params["b3"]
    value = h2 @ params["wv"] + params["bv"]
    inf_mask = jnp.maximum(jnp.log(action_mask.astype(jnp.float32)), FLOAT_MIN)
    return logits + inf_mask, value


if __name__ == "__main__":
    # Small shapes consistent with the module: flattened obs dict -> FC net.
    B = 8      # batch
    D = 32     # flattened observation dim
    H = 32     # fcnet hidden size (TorchFC default is 256; scaled down)
    A = 16     # num_outputs / action-space size

    key = jax.random.PRNGKey(0)
    k_obs, k_mask, k1, k2, k3, kv = jax.random.split(key, 6)

    obs = jax.random.normal(k_obs, (B, D), dtype=jnp.float32)
    # Bernoulli 0/1 action mask, stored narrow (bf16) to halve the mask byte stream;
    # ensure at least one legal action per row.
    action_mask = (jax.random.uniform(k_mask, (B, A)) > 0.5).astype(jnp.bfloat16)
    action_mask = action_mask.at[:, 0].set(1.0)

    def init_linear(k, fan_in, fan_out):
        scale = 1.0 / jnp.sqrt(jnp.float32(fan_in))
        return (jax.random.uniform(k, (fan_in, fan_out), jnp.float32, -scale, scale),
                jnp.zeros((1, fan_out), jnp.float32))

    w1, b1 = init_linear(k1, D, H)
    w2, b2 = init_linear(k2, H, H)
    w3, b3 = init_linear(k3, H, A)
    wv, bv = init_linear(kv, H, 1)
    params = dict(w1=w1, b1=b1, w2=w2, b2=b2, w3=w3, b3=b3, wv=wv, bv=bv)

    packed = pack_params(params)                      # one-time init-side packing
    fwd = jax.jit(action_mask_model_forward)

    masked_logits, value = fwd(obs, action_mask, packed)
    jax.block_until_ready((masked_logits, value))

    ref_logits, ref_value = reference_forward(obs, action_mask, params)
    # Kernel runs the matmuls in bf16 (f32 accumulation): compare with relaxed tolerance.
    # Masked entries are FLOAT_MIN-ish on both sides; compare only legal actions.
    legal = action_mask > 0
    assert jnp.allclose(jnp.where(legal, masked_logits, 0.0),
                        jnp.where(legal, ref_logits, 0.0), rtol=5e-2, atol=5e-2)
    assert jnp.all(jnp.where(legal, True, masked_logits <= FLOAT_MIN / 2))
    assert jnp.allclose(value, ref_value, rtol=5e-2, atol=5e-2)

    print("KERNEL_OK")
</pallas_src>

<mosaic_0001>
module attributes {stable_mosaic.version = 11 : i64} {
  func.func @action_mask_fc_kernel(%arg0: i32, %arg1: memref<16x32xf32, #tpu.memory_space<vmem>>, %arg2: memref<16x16xbf16, #tpu.memory_space<vmem>>, %arg3: memref<32x128xbf16, #tpu.memory_space<vmem>>, %arg4: memref<1x128xf32, #tpu.memory_space<vmem>>, %arg5: memref<128x128xbf16, #tpu.memory_space<vmem>>, %arg6: memref<1x128xf32, #tpu.memory_space<vmem>>, %arg7: memref<128x128xbf16, #tpu.memory_space<vmem>>, %arg8: memref<1x128xf32, #tpu.memory_space<vmem>>, %arg9: memref<16x16xf32, #tpu.memory_space<vmem>>, %arg10: memref<16x1xf32, #tpu.memory_space<vmem>>) attributes {dimension_semantics = [#tpu.dimension_semantics<parallel>], iteration_bounds = array<i64: 1>, scalar_prefetch = 0 : i64, scratch_operands = 0 : i64, tpu.core_type = #tpu.core_type<tc>, window_params = [{transform_indices = @transform_0, window_bounds = array<i64: 16, 32>}, {transform_indices = @transform_1, window_bounds = array<i64: 16, 16>}, {pipeline_mode = #tpu.pipeline_mode<synchronous>, transform_indices = @transform_2, window_bounds = array<i64: 32, 128>}, {pipeline_mode = #tpu.pipeline_mode<synchronous>, transform_indices = @transform_3, window_bounds = array<i64: 1, 128>}, {pipeline_mode = #tpu.pipeline_mode<synchronous>, transform_indices = @transform_4, window_bounds = array<i64: 128, 128>}, {pipeline_mode = #tpu.pipeline_mode<synchronous>, transform_indices = @transform_5, window_bounds = array<i64: 1, 128>}, {pipeline_mode = #tpu.pipeline_mode<synchronous>, transform_indices = @transform_6, window_bounds = array<i64: 128, 128>}, {pipeline_mode = #tpu.pipeline_mode<synchronous>, transform_indices = @transform_7, window_bounds = array<i64: 1, 128>}, {transform_indices = @transform_8, window_bounds = array<i64: 16, 16>}, {transform_indices = @transform_9, window_bounds = array<i64: 16, 1>}]} {
    %c0 = arith.constant 0 : index
    %c0_0 = arith.constant 0 : index
    %0 = vector.load %arg1[%c0, %c0_0] : memref<16x32xf32, #tpu.memory_space<vmem>>, vector<16x32xf32>
    %1 = arith.truncf %0 : vector<16x32xf32> to vector<16x32xbf16>
    %c0_1 = arith.constant 0 : index
    %c0_2 = arith.constant 0 : index
    %2 = vector.load %arg3[%c0_1, %c0_2] : memref<32x128xbf16, #tpu.memory_space<vmem>>, vector<32x128xbf16>
    %cst = arith.constant dense<0.000000e+00> : vector<16x128xf32>
    %3 = tpu.matmul %1, %2, %cst {dimension_numbers = #tpu.dot_dimension_numbers<[1], [0], [0], [1], [0, 0, 1, 1], [], []>} : vector<16x32xbf16>, vector<32x128xbf16>, vector<16x128xf32> -> vector<16x128xf32>
    %c0_3 = arith.constant 0 : index
    %c0_4 = arith.constant 0 : index
    %4 = vector.load %arg4[%c0_3, %c0_4] : memref<1x128xf32, #tpu.memory_space<vmem>>, vector<1x128xf32>
    %5 = vector.broadcast %4 : vector<1x128xf32> to vector<16x128xf32>
    %6 = arith.addf %3, %5 : vector<16x128xf32>
    %7 = math.tanh %6 : vector<16x128xf32>
    %8 = arith.truncf %7 : vector<16x128xf32> to vector<16x128xbf16>
    %c0_5 = arith.constant 0 : index
    %c0_6 = arith.constant 0 : index
    %9 = vector.load %arg5[%c0_5, %c0_6] : memref<128x128xbf16, #tpu.memory_space<vmem>>, vector<128x128xbf16>
    %cst_7 = arith.constant dense<0.000000e+00> : vector<16x128xf32>
    %10 = tpu.matmul %8, %9, %cst_7 {dimension_numbers = #tpu.dot_dimension_numbers<[1], [0], [0], [1], [0, 0, 1, 1], [], []>} : vector<16x128xbf16>, vector<128x128xbf16>, vector<16x128xf32> -> vector<16x128xf32>
    %c0_8 = arith.constant 0 : index
    %c0_9 = arith.constant 0 : index
    %11 = vector.load %arg6[%c0_8, %c0_9] : memref<1x128xf32, #tpu.memory_space<vmem>>, vector<1x128xf32>
    %12 = vector.broadcast %11 : vector<1x128xf32> to vector<16x128xf32>
    %13 = arith.addf %10, %12 : vector<16x128xf32>
    %14 = math.tanh %13 : vector<16x128xf32>
    %15 = arith.truncf %14 : vector<16x128xf32> to vector<16x128xbf16>
    %c0_10 = arith.constant 0 : index
    %c0_11 = arith.constant 0 : index
    %16 = vector.load %arg7[%c0_10, %c0_11] : memref<128x128xbf16, #tpu.memory_space<vmem>>, vector<128x128xbf16>
    %cst_12 = arith.constant dense<0.000000e+00> : vector<16x128xf32>
    %17 = tpu.matmul %15, %16, %cst_12 {dimension_numbers = #tpu.dot_dimension_numbers<[1], [0], [0], [1], [0, 0, 1, 1], [], []>} : vector<16x128xbf16>, vector<128x128xbf16>, vector<16x128xf32> -> vector<16x128xf32>
    %c0_13 = arith.constant 0 : index
    %c0_14 = arith.constant 0 : index
    %18 = vector.load %arg8[%c0_13, %c0_14] : memref<1x128xf32, #tpu.memory_space<vmem>>, vector<1x128xf32>
    %19 = vector.broadcast %18 : vector<1x128xf32> to vector<16x128xf32>
    %20 = arith.addf %17, %19 : vector<16x128xf32>
    %c0_15 = arith.constant 0 : index
    %c0_16 = arith.constant 0 : index
    %21 = vector.load %arg2[%c0_15, %c0_16] : memref<16x16xbf16, #tpu.memory_space<vmem>>, vector<16x16xbf16>
    %cst_17 = arith.constant 0.000000e+00 : bf16
    %22 = vector.broadcast %cst_17 : bf16 to vector<16x16xbf16>
    %23 = arith.cmpf ogt, %21, %22 : vector<16x16xbf16>
    %24 = vector.extract_strided_slice %20 {offsets = [0, 0], sizes = [16, 16], strides = [1, 1]} : vector<16x128xf32> to vector<16x16xf32>
    %cst_18 = arith.constant -3.400000e+38 : f32
    %25 = vector.broadcast %cst_18 : f32 to vector<16x16xf32>
    %26 = arith.select %23, %24, %25 : vector<16x16xi1>, vector<16x16xf32>
    %c0_19 = arith.constant 0 : index
    %c0_20 = arith.constant 0 : index
    %27 = vector.load %arg9[%c0_19, %c0_20] : memref<16x16xf32, #tpu.memory_space<vmem>>, vector<16x16xf32>
    tpu.vector_store %arg9[%c0_19, %c0_20], %26 {strides = array<i32>} : memref<16x16xf32, #tpu.memory_space<vmem>>, vector<16x16xf32>,
    %28 = vector.extract_strided_slice %20 {offsets = [0, 16], sizes = [16, 1], strides = [1, 1]} : vector<16x128xf32> to vector<16x1xf32>
    %c0_21 = arith.constant 0 : index
    %c0_22 = arith.constant 0 : index
    %29 = vector.load %arg10[%c0_21, %c0_22] : memref<16x1xf32, #tpu.memory_space<vmem>>, vector<16x1xf32>
    tpu.vector_store %arg10[%c0_21, %c0_22], %28 {strides = array<i32>} : memref<16x1xf32, #tpu.memory_space<vmem>>, vector<16x1xf32>,
    return
  }
  func.func @transform_0(%arg0: i32) -> (i32, i32) {
    %c0_i32 = arith.constant 0 : i32
    %c0_i32_0 = arith.constant 0 : i32
    return %arg0, %c0_i32 : i32, i32
  }
  func.func @transform_1(%arg0: i32) -> (i32, i32) {
    %c0_i32 = arith.constant 0 : i32
    %c0_i32_0 = arith.constant 0 : i32
    return %arg0, %c0_i32 : i32, i32
  }
  func.func @transform_2(%arg0: i32) -> (i32, i32) {
    %c0_i32 = arith.constant 0 : i32
    %c0_i32_0 = arith.constant 0 : i32
    %c0_i32_1 = arith.constant 0 : i32
    return %c0_i32, %c0_i32_0 : i32, i32
  }
  func.func @transform_3(%arg0: i32) -> (i32, i32) {
    %c0_i32 = arith.constant 0 : i32
    %c0_i32_0 = arith.constant 0 : i32
    %c0_i32_1 = arith.constant 0 : i32
    return %c0_i32, %c0_i32_0 : i32, i32
  }
  func.func @transform_4(%arg0: i32) -> (i32, i32) {
    %c0_i32 = arith.constant 0 : i32
    %c0_i32_0 = arith.constant 0 : i32
    %c0_i32_1 = arith.constant 0 : i32
    return %c0_i32, %c0_i32_0 : i32, i32
  }
  func.func @transform_5(%arg0: i32) -> (i32, i32) {
    %c0_i32 = arith.constant 0 : i32
    %c0_i32_0 = arith.constant 0 : i32
    %c0_i32_1 = arith.constant 0 : i32
    return %c0_i32, %c0_i32_0 : i32, i32
  }
  func.func @transform_6(%arg0: i32) -> (i32, i32) {
    %c0_i32 = arith.constant 0 : i32
    %c0_i32_0 = arith.constant 0 : i32
    %c0_i32_1 = arith.constant 0 : i32
    return %c0_i32, %c0_i32_0 : i32, i32
  }
  func.func @transform_7(%arg0: i32) -> (i32, i32) {
    %c0_i32 = arith.constant 0 : i32
    %c0_i32_0 = arith.constant 0 : i32
    %c0_i32_1 = arith.constant 0 : i32
    return %c0_i32, %c0_i32_0 : i32, i32
  }
  func.func @transform_8(%arg0: i32) -> (i32, i32) {
    %c0_i32 = arith.constant 0 : i32
    %c0_i32_0 = arith.constant 0 : i32
    return %arg0, %c0_i32 : i32, i32
  }
  func.func @transform_9(%arg0: i32) -> (i32, i32) {
    %c0_i32 = arith.constant 0 : i32
    %c0_i32_0 = arith.constant 0 : i32
    return %arg0, %c0_i32 : i32, i32
  }
}

</mosaic_0001>

<bundles_post_ra>
// kernel: action_mask_model_forward.1
= control target key start
LH: loop header
LB: loop body
LE: loop exit
PB: predicated region body
PF: predicated region fallthrough
CT: control target
= control target key end

     0   :  { %15 = vsyncpa [#allocation3], 0  ;;  %s871_s0 = inlined_call_operand.vmem [shape: f32[16,32], index: 0, kind: input, shape index: {}]   ;;  %s872_s1 = inlined_call_operand.vmem [shape: bf16[16,16], index: 1, kind: input, shape index: {}]   ;;  %s873_s2 = inlined_call_operand.hbm [shape: bf16[32,128], index: 2, kind: input, shape index: {}]   ;;  %s874_s3 = inlined_call_operand.hbm [shape: f32[1,128], index: 3, kind: input, shape index: {}]   ;;  %s875_s4 = inlined_call_operand.hbm [shape: bf16[128,128], index: 4, kind: input, shape index: {}]   ;;  %s876_s5 = inlined_call_operand.hbm [shape: f32[1,128], index: 5, kind: input, shape index: {}]   ;;  %s877_s6 = inlined_call_operand.vmem [shape: bf16[128,128], index: 6, kind: input, shape index: {}]   ;;  %s878_s7 = inlined_call_operand.hbm [shape: f32[1,128], index: 7, kind: input, shape index: {}]   ;;  %s879_s8 = inlined_call_operand.vmem [shape: f32[16,16], index: 8, kind: output, shape index: {0}]   ;;  %s880_s9 = inlined_call_operand.vmem [shape: f32[16,1], index: 9, kind: output, shape index: {1}]  }
   0x1   :  { %16 = vsyncpa [#allocation5], 0 }
   0x2   :  { %17 = vsyncpa [#allocation8], 0  ;;  %s678_s30 = smov [#allocation4]   ;;  %s679_s11 = smov [#allocation7]  }
   0x3   :  { %s40_s10 = sshll.u32 %s678_s30, 4  ;;  %s62_s12 = sshll.u32 %s679_s11, 4  ;;  %s41_s10 = int_to_ptr.vmem [resolvable:$true] %s40_s10  ;;  %s63_s12 = int_to_ptr.vmem [resolvable:$true] %s62_s12 }
   0x4   :  { %s562_s15 = scalar_lea.hbm %s874_s3, 16 }
   0x5   :  { %p563_p0 = scmp.ne.s32.totalorder %s874_s3, %s562_s15  ;;  %p566_p1 = scmp.lt.u32.totalorder %s562_s15, %s874_s3 }
   0x7   :  { %p568_p2 = pnand %p566_p1, %p563_p0 }
   0x9   :  { %571 = shalt.err (!%p568_p2)
}
   0xa   :  { %s572_s20 = scalar_lea.vmem %s41_s10, 16  ;;  %s576_s21 = scalar_lea.vmem %s41_s10, 32 }
   0xb   :  { %p573_p3 = scmp.ne.s32.totalorder %s41_s10, %s572_s20  ;;  %p577_p4 = scmp.lt.s32.totalorder %s41_s10, %s41_s10 }
   0xc   :  { %p578_p5 = scmp.lt.s32.totalorder %s576_s21, %s572_s20 }
   0xe   :  { %p579_p6 = por %p578_p5, %p577_p4 }
  0x10   :  { %p580_p7 = pnand %p579_p6, %p573_p3 }
  0x12   :  { %583 = shalt.err (!%p580_p7)
}
  0x13   :  { %43 = dma.hbm_to_vmem [thread:$0]  %s874_s3, 16, %s41_s10, [#allocation5]  }
  0x14   :  { %s584_s26 = scalar_lea.hbm %s876_s5, 16 }
  0x15   :  { %p585_p8 = scmp.ne.s32.totalorder %s876_s5, %s584_s26  ;;  %p588_p9 = scmp.lt.u32.totalorder %s584_s26, %s876_s5 }
  0x17   :  { %p590_p10 = pnand %p588_p9, %p585_p8 }
  0x19   :  { %593 = shalt.err (!%p590_p10)
}
  0x1a   :  { %s594_s11 = scalar_lea.vmem %s63_s12, 16  ;;  %s598_s13 = scalar_lea.vmem %s63_s12, 32 }
  0x1b   :  { %p595_p11 = scmp.ne.s32.totalorder %s63_s12, %s594_s11  ;;  %p599_p12 = scmp.lt.s32.totalorder %s63_s12, %s63_s12 }
  0x1c   :  { %p600_p13 = scmp.lt.s32.totalorder %s598_s13, %s594_s11 }
  0x1e   :  { %p601_p0 = por %p600_p13, %p599_p12 }
  0x20   :  { %p602_p1 = pnand %p601_p0, %p595_p11 }
  0x22   :  { %605 = shalt.err (!%p602_p1)
}
  0x23   :  { %65 = dma.hbm_to_vmem [thread:$0]  %s876_s5, 16, %s63_s12, [#allocation8]  }
  0x24   :  { %s680_s14 = smov [#allocation2]   ;;  %s606_s18 = scalar_lea.hbm %s873_s2, 256 }
  0x25   :  { %s27_s15 = sshll.u32 %s680_s14, 4  ;;  %p607_p2 = scmp.ne.s32.totalorder %s873_s2, %s606_s18  ;;  %s28_s15 = int_to_ptr.vmem [resolvable:$true] %s27_s15 }
  0x26   :  { %p610_p3 = scmp.lt.u32.totalorder %s606_s18, %s873_s2 }
  0x28   :  { %p612_p4 = pnand %p610_p3, %p607_p2 }
  0x2a   :  { %615 = shalt.err (!%p612_p4)
}
  0x2b   :  { %s616_s23 = scalar_lea.vmem %s28_s15, 256  ;;  %p621_p6 = scmp.lt.s32.totalorder %s28_s15, %s28_s15 }
  0x2c   :  { %p617_p5 = scmp.ne.s32.totalorder %s28_s15, %s616_s23  ;;  %p622_p7 = scmp.lt.s32.totalorder %s616_s23, %s616_s23 }
  0x2e   :  { %p623_p8 = por %p622_p7, %p621_p6 }
  0x30   :  { %p624_p9 = pnand %p623_p8, %p617_p5 }
  0x32   :  { %627 = shalt.err (!%p624_p9)
}
  0x33   :  { %s681_s5 = smov 64   ;;  %s682_s12 = smov 4  }
  0x34   :  { %33 = dma.hbm_to_vmem [thread:$0]  %s873_s2, 256, %s28_s15, [#allocation3], %s681_s5, %s681_s5, %s682_s12  }
  0x35   :  { %s683_s26 = smov [#allocation6]   ;;  %s684_s28 = smov [#allocation9]  }
  0x36   :  { %s49_s27 = sshll.u32 %s683_s26, 4  ;;  %s74_s29 = sshll.u32 %s684_s28, 4  ;;  %s50_s27 = int_to_ptr.vmem [resolvable:$true] %s49_s27  ;;  %s75_s29 = int_to_ptr.vmem [resolvable:$true] %s74_s29 }
  0x37   :  { %s628_s13 = scalar_lea.hbm %s875_s4, 1024 }
  0x38   :  { %p629_p10 = scmp.ne.s32.totalorder %s875_s4, %s628_s13  ;;  %p632_p11 = scmp.lt.u32.totalorder %s628_s13, %s875_s4 }
  0x3a   :  { %p634_p12 = pnand %p632_p11, %p629_p10 }
  0x3c   :  { %637 = shalt.err (!%p634_p12)
}
  0x3d   :  { %s638_s2 = scalar_lea.vmem %s50_s27, 1024  ;;  %p643_p0 = scmp.lt.s32.totalorder %s50_s27, %s50_s27 }
  0x3e   :  { %p639_p13 = scmp.ne.s32.totalorder %s50_s27, %s638_s2  ;;  %p644_p1 = scmp.lt.s32.totalorder %s638_s2, %s638_s2 }
  0x40   :  { %p645_p2 = por %p644_p1, %p643_p0 }
  0x42   :  { %p646_p3 = pnand %p645_p2, %p639_p13 }
  0x44   :  { %649 = shalt.err (!%p646_p3)
}
  0x45   :  { %55 = dma.hbm_to_vmem [thread:$0]  %s875_s4, 1024, %s50_s27, [#allocation5], %s681_s5, %s681_s5, %s682_s12  }
  0x46   :  { %s650_s20 = scalar_lea.hbm %s878_s7, 16 }
  0x47   :  { %p651_p4 = scmp.ne.s32.totalorder %s878_s7, %s650_s20  ;;  %p654_p5 = scmp.lt.u32.totalorder %s650_s20, %s878_s7 }
  0x49   :  { %p656_p6 = pnand %p654_p5, %p651_p4 }
  0x4b   :  { %659 = shalt.err (!%p656_p6)
}
  0x4c   :  { %s660_s25 = scalar_lea.vmem %s75_s29, 16  ;;  %s664_s26 = scalar_lea.vmem %s75_s29, 32 }
  0x4d   :  { %p661_p7 = scmp.ne.s32.totalorder %s75_s29, %s660_s25  ;;  %p665_p8 = scmp.lt.s32.totalorder %s75_s29, %s75_s29 }
  0x4e   :  { %p666_p9 = scmp.lt.s32.totalorder %s664_s26, %s660_s25 }
  0x50   :  { %p667_p10 = por %p666_p9, %p665_p8 }
  0x52   :  { %p668_p11 = pnand %p667_p10, %p661_p7 }
  0x54   :  { %671 = shalt.err (!%p668_p11)
}
  0x55   :  { %77 = dma.hbm_to_vmem [thread:$0]  %s878_s7, 16, %s75_s29, [#allocation8]  }
  0x56   :  { %672 = dma.done.wait [#allocation3], 256  }
  0x57   :  { %673 = vsyncadd [#allocation3], 4294967040 }
  0x58   :  { %674 = dma.done.wait [#allocation5], 1040  }
  0x59   :  { %675 = vsyncadd [#allocation5], 4294966256 }
  0x5a   :  { %676 = dma.done.wait [#allocation8], 32  }
  0x5b   :  { %677 = vsyncadd [#allocation8], 4294967264  ;;  %v685_v0 = vmov 0.0   ;;  %vm686_vm0 = vmmov 0   ;;  %v536_v1 = vld [vmem:[#allocation2] sm:$0xff]   ;;  %v537_v2 = vld [vmem:[#allocation2 + $0x8] sm:$0xff]  }
  0x5c   :  { %477 = vmatprep.subr.bf16.mxu0 %v685_v0  ;;  %481 = vmatprep.mubr.msk.bf16.mxu0 %vm686_vm0, %v685_v0  ;;  %v96_v3 = vld [vmem:[%s871_s0] sm:$0xff]  ;;  %v97_v4 = vld [vmem:[%s871_s0 + $0x8] sm:$0xff]  ;;  %v538_v5 = vld [vmem:[#allocation6] sm:$0xff]   ;;  %vm122_vm1 = vcmask 261120   ;;  %v687_v44 = vmov 0   ;;  %vm409_vm5 = vcmask 130048  }
  0x5d   :  { %485 = vmatprep.subr.bf16.mxu1 %v685_v0  ;;  %501 = vmatprep.mubr.msk.bf16.mxu1 %vm686_vm0, %v685_v0  ;;  %v98_v6 = vpack.c.bf16 %v97_v4, %v96_v3  ;;  %v539_v7 = vld [vmem:[#allocation6 + $0x8] sm:$0xff]   ;;  %v540_v8 = vld [vmem:[#allocation6 + $0x10] sm:$0xff]   ;;  %v541_v9 = vld [vmem:[#allocation6 + $0x18] sm:$0xff]   ;;  %s688_s25 = smov 112   ;;  %vm420_vm7 = vcmask 7168  }
  0x5e   :  { %478 = vmatpush3.bf16.msra.mxu0 %v536_v1  ;;  %486 = vmatpush3.bf16.msra.mxu1 %v538_v5  ;;  %v542_v10 = vld [vmem:[#allocation6 + $0x20] sm:$0xff]   ;;  %v543_v11 = vld [vmem:[#allocation6 + $0x28] sm:$0xff]   ;;  %v544_v12 = vld [vmem:[#allocation6 + $0x30] sm:$0xff]  }
  0x5f   :  { %479 = vmatprep.subr.bf16.mxu0 %v685_v0  ;;  %487 = vmatprep.subr.bf16.mxu1 %v685_v0  ;;  %v545_v13 = vld [vmem:[#allocation6 + $0x38] sm:$0xff]   ;;  %v546_v14 = vld [vmem:[%s877_s6] sm:$0xff]   ;;  %v549_v17 = vld [vmem:[%s877_s6 + $0x18] sm:$0xff]  }
  0x60   :  { %v547_v15 = vld [vmem:[%s877_s6 + $0x8] sm:$0xff]   ;;  %v548_v16 = vld [vmem:[%s877_s6 + $0x10] sm:$0xff]   ;;  %v550_v28 = vld [vmem:[%s877_s6 + $0x20] sm:$0xff]  }
  0x61   :  { %v434_v18 = vld [vmem:[#allocation4] ss:$0 sm:$0xff]  ;;  %v551_v29 = vld [vmem:[%s877_s6 + $0x28] sm:$0xff]   ;;  %v553_v31 = vld [vmem:[%s877_s6 + $0x38] sm:$0xff]  }
  0x62   :  { %480 = vmatpush3.bf16.msra.mxu0 %v537_v2  ;;  %488 = vmatpush3.bf16.msra.mxu1 %v539_v7  ;;  %v552_v30 = vld [vmem:[%s877_s6 + $0x30] sm:$0xff]   ;;  %v397_v42 = vld [vmem:[%s872_s1] sm:$0xf]  ;;  %v398_v43 = vld [vmem:[%s872_s1 + $0x4] sm:$0xf] }
  0x63   :  { %505 = vmatprep.subr.bf16.mxu0 %v685_v0  ;;  %489 = vmatprep.subr.bf16.mxu1 %v685_v0  ;;  %v438_v32 = vld [vmem:[#allocation7] ss:$0 sm:$0xff]  ;;  %vm399_vm2 = vcmp.gt.bf16.partialorder %v397_v42, 0  ;;  %vm400_vm3 = vcmp.gt.bf16.partialorder %v398_v43, 0  ;;  %v447_v48 = vld [vmem:[#allocation9] ss:$0 sm:$0xff] }
  0x64   :  { %v401_v45 = vsel %vm399_vm2, 65537, %v687_v44  ;;  %v402_v46 = vsel %vm400_vm3, 65537, %v687_v44 }
  0x65   :  { %482 = vmatmul.mubr.msk.bf16.vlgmr.msra.gmra.mrb[0].mxu0 %vm122_vm1, %v98_v6  ;;  %v403_v47 = vunpack.c.l.b16 %v401_v45  ;;  %v404_v49 = vunpack.c.l.b16 %v402_v46 }
  0x66   :  { %521 = vmatprep.mubr.msk.bf16.mxu0 %vm686_vm0, %v685_v0  ;;  %490 = vmatpush3.bf16.msra.mxu1 %v540_v8 }
  0x67   :  { %491 = vmatprep.subr.bf16.mxu1 %v685_v0  ;;  %506 = vmatpush3.bf16.msra.mxu0 %v546_v14  ;;  %vm405_vm4 = vcmp.ne.s32.totalorder %v403_v47, 0  ;;  %vm406_vm6 = vcmp.ne.s32.totalorder %v404_v49, 0 }
  0x68   :  { %507 = vmatprep.subr.bf16.mxu0 %v685_v0 }
  0x6a   :  { %492 = vmatpush3.bf16.msra.mxu1 %v541_v9 }
  0x6b   :  { %493 = vmatprep.subr.bf16.mxu1 %v685_v0  ;;  %508 = vmatpush3.bf16.msra.mxu0 %v547_v15 }
  0x6c   :  { %509 = vmatprep.subr.bf16.mxu0 %v685_v0 }
  0x6e   :  { %494 = vmatpush3.bf16.msra.mxu1 %v542_v10 }
  0x6f   :  { %495 = vmatprep.subr.bf16.mxu1 %v685_v0  ;;  %510 = vmatpush3.bf16.msra.mxu0 %v548_v16 }
  0x70   :  { %511 = vmatprep.subr.bf16.mxu0 %v685_v0 }
  0x72   :  { %496 = vmatpush3.bf16.msra.mxu1 %v543_v11 }
  0x73   :  { %497 = vmatprep.subr.bf16.mxu1 %v685_v0  ;;  %512 = vmatpush3.bf16.msra.mxu0 %v549_v17 }
  0x74   :  { %513 = vmatprep.subr.bf16.mxu0 %v685_v0 }
  0x76   :  { %498 = vmatpush3.bf16.msra.mxu1 %v544_v12 }
  0x77   :  { %499 = vmatprep.subr.bf16.mxu1 %v685_v0  ;;  %514 = vmatpush3.bf16.msra.mxu0 %v550_v28 }
  0x78   :  { %515 = vmatprep.subr.bf16.mxu0 %v685_v0 }
  0x7a   :  { %500 = vmatpush3.bf16.msra.mxu1 %v545_v13 }
  0x7b   :  { %516 = vmatpush3.bf16.msra.mxu0 %v551_v29 }
  0x7c   :  { %517 = vmatprep.subr.bf16.mxu0 %v685_v0 }
  0x7f   :  { %518 = vmatpush3.bf16.msra.mxu0 %v552_v30 }
  0x80   :  { %519 = vmatprep.subr.bf16.mxu0 %v685_v0 }
  0x83   :  { %520 = vmatpush3.bf16.msra.mxu0 %v553_v31 }
 0x138   :  { %v160_v19 = vpop.f32.mrb[0].mxu0 }
 0x139   :  { %v161_v20 = vadd.f32 %v434_v18, %v160_v19  ;;  %v483_v21 = vpop.f32.mrb[1].mxu0 }
 0x13a   :  { %v163_v22 = vpop.f32.mrb[2].mxu0 }
 0x13b   :  { %v164_v23 = vadd.f32 %v434_v18, %v163_v22  ;;  %v484_v24 = vpop.f32.mrb[3].mxu0  ;;  %554 = vtanh.f32 %v161_v20 }
 0x13d   :  { %556 = vtanh.f32 %v164_v23 }
 0x145   :  { %v555_v25 = vpop.eup %554 }
 0x147   :  { %v557_v26 = vpop.eup %556 }
 0x148   :  { %v169_v27 = vpack.c.bf16 %v557_v26, %v555_v25 }
 0x14a   :  { %502 = vmatmul.mubr.bf16.vlgmr.msra.gmra.mrb[0].mxu1 %v169_v27 }
 0x21d   :  { %v275_v33 = vpop.f32.mrb[0].mxu1 }
 0x21e   :  { %v276_v34 = vadd.f32 %v438_v32, %v275_v33  ;;  %v503_v35 = vpop.f32.mrb[1].mxu1 }
 0x21f   :  { %v278_v36 = vpop.f32.mrb[2].mxu1 }
 0x220   :  { %v279_v37 = vadd.f32 %v438_v32, %v278_v36  ;;  %v504_v38 = vpop.f32.mrb[3].mxu1  ;;  %558 = vtanh.f32 %v276_v34 }
 0x222   :  { %560 = vtanh.f32 %v279_v37 }
 0x22a   :  { %v559_v39 = vpop.eup %558 }
 0x22c   :  { %v561_v40 = vpop.eup %560 }
 0x22d   :  { %v284_v41 = vpack.c.bf16 %v561_v40, %v559_v39 }
 0x22f   :  { %522 = vmatmul.mubr.bf16.vlgmr.msra.gmra.mrb[4].mxu0 %v284_v41 }
 0x302   :  { %v390_v50 = vpop.f32.mrb[4].mxu0 }
 0x303   :  { %v391_v51 = vadd.f32 %v447_v48, %v390_v50  ;;  %v523_v52 = vpop.f32.mrb[5].mxu0 }
 0x304   :  { %v393_v53 = vpop.f32.mrb[6].mxu0 }
 0x305   :  { %v407_v54 = vsel %vm405_vm4, %v391_v51, -3.4e+38  ;;  %v394_v55 = vadd.f32 %v447_v48, %v393_v53  ;;  %414 = vrot.lane.b32.xlu0 %v391_v51, %s688_s25  ;;  %v524_v56 = vpop.f32.mrb[7].mxu0 }
 0x306   :  { %410 = vst.msk [vmem:[%s879_s8] sm:$0xff] %vm409_vm5, %v407_v54 }
 0x307   :  { %v408_v57 = vsel %vm406_vm6, %v394_v55, -3.4e+38 }
 0x308   :  { %411 = vst.msk [vmem:[%s879_s8 + $0x8] sm:$0xff] %vm409_vm5, %v408_v57 }
 0x309   :  { %416 = vrot.lane.b32.xlu0 %v394_v55, %s688_s25 }
 0x377   :  { %v415_v58 = vpop.permute.xlu0 %414 }
 0x378   :  { %421 = vst.msk [vmem:[%s880_s9] sm:$0xff] %vm420_vm7, %v415_v58 }
 0x37b   :  { %v417_v59 = vpop.permute.xlu0 %416 }
 0x37c   :  { %422 = vst.msk [vmem:[%s880_s9 + $0x8] sm:$0xff] %vm420_vm7, %v417_v59 }
 0x37d   :  { %431 = vsyncpa [#allocation3], 1 }
 0x37e   :  { %432 = vsyncpa [#allocation5], 1 }
 0x37f   :  { %433 = vsyncpa [#allocation8], 1 }

</bundles_post_ra>
